<compile_context>
chip_gen: v5e
topology: v5e:2x2
jax: 0.10.0
libtpu: 0.0.40
codegen_flags: <defaults>
</compile_context>

<pallas_src>
import jax
import jax.numpy as jnp
from jax import lax
from jax.experimental import pallas as pl
from jax.experimental.pallas import tpu as pltpu

LN_EPS = 1e-5  # nn.LayerNorm default


def bert_embeddings_kernel(ids_ref,          # SMEM (B*S,) int32  (scalar prefetch)
                           tok_tab_hbm,      # HBM  (V, H)        (manual DMA gather)
                           pos_ref,          # VMEM (TS, H)       position rows of this tile
                           onehot_ref,       # VMEM (TS, TV)      segment one-hot
                           seg_tab_ref,      # VMEM (TV, H)       segment table (invariant)
                           gamma_ref,        # VMEM (1, H)
                           beta_ref,         # VMEM (1, H)
                           out_ref,          # VMEM (TS, H)       output tile (batch dim squeezed)
                           tok_buf,          # VMEM (TS, H)       staging for gathered token rows
                           copy_sems):       # DMA semaphores (TS,)
    b = pl.program_id(0)
    t = pl.program_id(1)
    ts = tok_buf.shape[0]
    seq_len = pl.num_programs(1) * ts
    base = b * seq_len + t * ts              # flat offset into the (B*S,) id array

    # --- Token gather: issue all TS row DMAs (HBM -> VMEM) concurrently, then wait.
    @pl.loop(0, ts)
    def _(j):
        tok_id = ids_ref[base + j]
        pltpu.make_async_copy(tok_tab_hbm.at[pl.ds(tok_id, 1), :],
                              tok_buf.at[pl.ds(j, 1), :],
                              copy_sems.at[j]).start()

    @pl.loop(0, ts)
    def _(j):
        tok_id = ids_ref[base + j]
        pltpu.make_async_copy(tok_tab_hbm.at[pl.ds(tok_id, 1), :],
                              tok_buf.at[pl.ds(j, 1), :],
                              copy_sems.at[j]).wait()

    # --- Vectorized segment embedding: one-hot blend over the tiny segment table.
    onehot = onehot_ref[...]                                  # (TS, TV)
    seg_tab = seg_tab_ref[...].astype(jnp.float32)            # (TV, H)
    seg_emb = onehot[:, 0:1] * seg_tab[0:1, :]                # (TS, H)
    for v in range(1, seg_tab.shape[0]):                      # static, TV is tiny
        seg_emb = seg_emb + onehot[:, v:v + 1] * seg_tab[v:v + 1, :]

    # --- 3-way sum (no scratch round trip).
    x = (tok_buf[...].astype(jnp.float32)
         + pos_ref[...].astype(jnp.float32)
         + seg_emb)                                           # (TS, H) f32

    # --- LayerNorm with fused reductions: var = E[x^2] - mean^2.
    h = x.shape[-1]
    s1 = jnp.sum(x, axis=-1, keepdims=True)
    s2 = jnp.sum(x * x, axis=-1, keepdims=True)
    mean = s1 * (1.0 / h)
    var = s2 * (1.0 / h) - mean * mean
    y = (x - mean) * lax.rsqrt(var + LN_EPS)
    y = y * gamma_ref[...] + beta_ref[...]                    # (1,H) broadcasts over (TS,H)

    # Dropout: eval mode -> identity.
    out_ref[...] = y.astype(out_ref.dtype)


def _pick_token_tile(S, want):
    for cand in (want, 512, 256, 128, 64, 32, 16, 8):
        if cand <= S and S % cand == 0 and cand % 8 == 0:
            return cand
    return S


def bert_embeddings(input_ids, token_type_ids, tok_tab, pos_tab, seg_tab, gamma, beta,
                    *, token_tile=256):
    B, S = input_ids.shape
    V, H = tok_tab.shape
    TV = seg_tab.shape[0]
    if token_type_ids is None:
        token_type_ids = jnp.zeros_like(input_ids)
    assert pos_tab.shape[0] >= S, "sequence longer than max_position_embeddings"

    ts = _pick_token_tile(S, token_tile)
    grid = (B, S // ts)

    # Host-side prep (all tiny): flat ids for SMEM, one-hot segment ids, pos slice.
    ids_flat = input_ids.reshape(-1).astype(jnp.int32)             # (B*S,)
    seg_onehot = jax.nn.one_hot(token_type_ids, TV, dtype=jnp.float32)  # (B, S, TV)
    pos_used = pos_tab[:S]                                         # (S, H)
    gamma2 = gamma.reshape(1, H).astype(jnp.float32)
    beta2 = beta.reshape(1, H).astype(jnp.float32)

    grid_spec = pltpu.PrefetchScalarGridSpec(
        num_scalar_prefetch=1,
        grid=grid,
        in_specs=[
            pl.BlockSpec(memory_space=pl.ANY),                          # token table stays in HBM
            pl.BlockSpec((ts, H), lambda b, t, ids: (t, 0)),            # position rows of this tile
            pl.BlockSpec((None, ts, TV), lambda b, t, ids: (b, t, 0)),  # segment one-hot
            pl.BlockSpec((TV, H), lambda b, t, ids: (0, 0)),            # segment table (invariant)
            pl.BlockSpec((1, H), lambda b, t, ids: (0, 0)),             # gamma (invariant)
            pl.BlockSpec((1, H), lambda b, t, ids: (0, 0)),             # beta  (invariant)
        ],
        out_specs=pl.BlockSpec((None, ts, H), lambda b, t, ids: (b, t, 0)),
        scratch_shapes=[
            pltpu.VMEM((ts, H), tok_tab.dtype),      # staging for DMA-gathered token rows
            pltpu.SemaphoreType.DMA((ts,)),          # one completion sem per in-flight row
        ],
    )

    return pl.pallas_call(
        bert_embeddings_kernel,
        out_shape=jax.ShapeDtypeStruct((B, S, H), jnp.float32),
        grid_spec=grid_spec,
        compiler_params=pltpu.CompilerParams(
            dimension_semantics=("parallel", "parallel")),
    )(ids_flat, tok_tab, pos_used, seg_onehot, seg_tab, gamma2, beta2)


def bert_embeddings_ref(input_ids, token_type_ids, tok_tab, pos_tab, seg_tab, gamma, beta):
    S = input_ids.shape[1]
    x = tok_tab[input_ids] + pos_tab[jnp.arange(S)][None, :, :] + seg_tab[token_type_ids]
    mean = x.mean(-1, keepdims=True)
    var = ((x - mean) ** 2).mean(-1, keepdims=True)
    y = (x - mean) * lax.rsqrt(var + LN_EPS)
    return y * gamma.reshape(1, 1, -1) + beta.reshape(1, 1, -1)


if __name__ == "__main__":
    # Small, deterministic configuration.
    vocab_size = 64
    hidden_size = 128
    max_position_embeddings = 32
    type_vocab_size = 2
    B, S = 2, 16

    key = jax.random.PRNGKey(0)
    k_tok, k_pos, k_seg, k_ids, k_segids = jax.random.split(key, 5)

    tok_tab = jax.random.normal(k_tok, (vocab_size, hidden_size), jnp.float32) * 0.02
    pos_tab = jax.random.normal(k_pos, (max_position_embeddings, hidden_size), jnp.float32) * 0.02
    seg_tab = jax.random.normal(k_seg, (type_vocab_size, hidden_size), jnp.float32) * 0.02
    gamma = jnp.ones((hidden_size,), jnp.float32)    # LayerNorm weight init
    beta = jnp.zeros((hidden_size,), jnp.float32)    # LayerNorm bias init

    input_ids = jax.random.randint(k_ids, (B, S), 0, vocab_size, dtype=jnp.int32)
    token_type_ids = jax.random.randint(k_segids, (B, S), 0, type_vocab_size, dtype=jnp.int32)

    # token_tile=8 -> grid (B, S//8) = (2, 2): exercises the token-tiling path.
    out = bert_embeddings(input_ids, token_type_ids, tok_tab, pos_tab, seg_tab, gamma, beta,
                          token_tile=8)
    out = jax.block_until_ready(out)

    ref = bert_embeddings_ref(input_ids, token_type_ids, tok_tab, pos_tab, seg_tab, gamma, beta)
    assert out.shape == (B, S, hidden_size)
    assert jnp.allclose(out, ref, atol=1e-5, rtol=1e-5), float(jnp.abs(out - ref).max())

    print("KERNEL_OK")
</pallas_src>

<mosaic_0001>
module attributes {stable_mosaic.version = 11 : i64} {
  func.func @bert_embeddings_kernel(%arg0: i32, %arg1: i32, %arg2: memref<32xi32, #tpu.memory_space<smem>>, %arg3: memref<64x128xf32, #tpu.memory_space<any>>, %arg4: memref<8x128xf32, #tpu.memory_space<vmem>>, %arg5: memref<1x8x2xf32, #tpu.memory_space<vmem>>, %arg6: memref<2x128xf32, #tpu.memory_space<vmem>>, %arg7: memref<1x128xf32, #tpu.memory_space<vmem>>, %arg8: memref<1x128xf32, #tpu.memory_space<vmem>>, %arg9: memref<1x8x128xf32, #tpu.memory_space<vmem>>, %arg10: memref<8x128xf32, #tpu.memory_space<vmem>>, %arg11: memref<8x!tpu.dma_semaphore, #tpu.memory_space<semaphore_mem>>) attributes {dimension_semantics = [#tpu.dimension_semantics<parallel>, #tpu.dimension_semantics<parallel>], iteration_bounds = array<i64: 2, 2>, scalar_prefetch = 1 : i64, scratch_operands = 2 : i64, tpu.core_type = #tpu.core_type<tc>, window_params = [{}, {transform_indices = @transform_1, window_bounds = array<i64: 8, 128>}, {transform_indices = @transform_2, window_bounds = array<i64: 1, 8, 2>}, {pipeline_mode = #tpu.pipeline_mode<synchronous>, transform_indices = @transform_3, window_bounds = array<i64: 2, 128>}, {pipeline_mode = #tpu.pipeline_mode<synchronous>, transform_indices = @transform_4, window_bounds = array<i64: 1, 128>}, {pipeline_mode = #tpu.pipeline_mode<synchronous>, transform_indices = @transform_5, window_bounds = array<i64: 1, 128>}, {transform_indices = @transform_6, window_bounds = array<i64: 1, 8, 128>}]} {
    %c16_i32 = arith.constant 16 : i32
    %0 = arith.muli %arg0, %c16_i32 : i32
    %c8_i32 = arith.constant 8 : i32
    %1 = arith.muli %arg1, %c8_i32 : i32
    %2 = arith.addi %0, %1 : i32
    %c0_i32 = arith.constant 0 : i32
    %c8_i32_0 = arith.constant 8 : i32
    %3 = arith.addi %c0_i32, %c8_i32_0 : i32
    %c1_i32 = arith.constant 1 : i32
    scf.for %arg12 = %c0_i32 to %3 step %c1_i32  : i32 {
      %c1_i32_25 = arith.constant 1 : i32
      %50 = arith.muli %arg12, %c1_i32_25 : i32
      %c0_i32_26 = arith.constant 0 : i32
      %51 = arith.addi %c0_i32_26, %50 : i32
      %52 = arith.addi %2, %51 : i32
      %53 = arith.index_cast %52 : i32 to index
      %54 = memref.load %arg2[%53] : memref<32xi32, #tpu.memory_space<smem>>
      %c0_i32_27 = arith.constant 0 : i32
      %55 = tpu.memref_slice %arg3[%54, %c0_i32_27] : memref<64x128xf32, #tpu.memory_space<any>> -> memref<1x128xf32, #tpu.memory_space<any>>
      %c0_i32_28 = arith.constant 0 : i32
      %56 = tpu.memref_slice %arg10[%51, %c0_i32_28] : memref<8x128xf32, #tpu.memory_space<vmem>> -> memref<1x128xf32, #tpu.memory_space<vmem>>
      %57 = tpu.memref_slice %arg11[%51] : memref<8x!tpu.dma_semaphore, #tpu.memory_space<semaphore_mem>> -> memref<1x!tpu.dma_semaphore, #tpu.memory_space<semaphore_mem>>
      %58 = tpu.memref_squeeze %57 : memref<1x!tpu.dma_semaphore, #tpu.memory_space<semaphore_mem>> -> memref<!tpu.dma_semaphore, #tpu.memory_space<semaphore_mem>>
      tpu.enqueue_dma source(%55 : memref<1x128xf32, #tpu.memory_space<any>>) target(%56 : memref<1x128xf32, #tpu.memory_space<vmem>>) target_semaphore(%58 : memref<!tpu.dma_semaphore, #tpu.memory_space<semaphore_mem>>)
    }
    %c8_i32_1 = arith.constant 8 : i32
    %c0_i32_2 = arith.constant 0 : i32
    %c8_i32_3 = arith.constant 8 : i32
    %4 = arith.addi %c0_i32_2, %c8_i32_3 : i32
    %c1_i32_4 = arith.constant 1 : i32
    scf.for %arg12 = %c0_i32_2 to %4 step %c1_i32_4  : i32 {
      %c1_i32_25 = arith.constant 1 : i32
      %50 = arith.muli %arg12, %c1_i32_25 : i32
      %c0_i32_26 = arith.constant 0 : i32
      %51 = arith.addi %c0_i32_26, %50 : i32
      %52 = arith.addi %2, %51 : i32
      %53 = arith.index_cast %52 : i32 to index
      %54 = memref.load %arg2[%53] : memref<32xi32, #tpu.memory_space<smem>>
      %c0_i32_27 = arith.constant 0 : i32
      %55 = tpu.memref_slice %arg3[%54, %c0_i32_27] : memref<64x128xf32, #tpu.memory_space<any>> -> memref<1x128xf32, #tpu.memory_space<any>>
      %c0_i32_28 = arith.constant 0 : i32
      %56 = tpu.memref_slice %arg10[%51, %c0_i32_28] : memref<8x128xf32, #tpu.memory_space<vmem>> -> memref<1x128xf32, #tpu.memory_space<vmem>>
      %57 = tpu.memref_slice %arg11[%51] : memref<8x!tpu.dma_semaphore, #tpu.memory_space<semaphore_mem>> -> memref<1x!tpu.dma_semaphore, #tpu.memory_space<semaphore_mem>>
      %58 = tpu.memref_squeeze %57 : memref<1x!tpu.dma_semaphore, #tpu.memory_space<semaphore_mem>> -> memref<!tpu.dma_semaphore, #tpu.memory_space<semaphore_mem>>
      tpu.wait_dma2 semaphore(%58 : memref<!tpu.dma_semaphore, #tpu.memory_space<semaphore_mem>>) src(%55 : memref<1x128xf32, #tpu.memory_space<any>>) dst(%56 : memref<1x128xf32, #tpu.memory_space<vmem>>)
    }
    %c8_i32_5 = arith.constant 8 : i32
    %c0 = arith.constant 0 : index
    %c0_6 = arith.constant 0 : index
    %c0_7 = arith.constant 0 : index
    %5 = vector.load %arg5[%c0, %c0_6, %c0_7] : memref<1x8x2xf32, #tpu.memory_space<vmem>>, vector<1x8x2xf32>
    %6 = vector.shape_cast %5 : vector<1x8x2xf32> to vector<8x2xf32>
    %c0_8 = arith.constant 0 : index
    %c0_9 = arith.constant 0 : index
    %7 = vector.load %arg6[%c0_8, %c0_9] : memref<2x128xf32, #tpu.memory_space<vmem>>, vector<2x128xf32>
    %8 = vector.extract_strided_slice %6 {offsets = [0, 0], sizes = [8, 1], strides = [1, 1]} : vector<8x2xf32> to vector<8x1xf32>
    %9 = vector.extract_strided_slice %7 {offsets = [0, 0], sizes = [1, 128], strides = [1, 1]} : vector<2x128xf32> to vector<1x128xf32>
    %10 = vector.broadcast %8 : vector<8x1xf32> to vector<8x128xf32>
    %11 = vector.broadcast %9 : vector<1x128xf32> to vector<8x128xf32>
    %12 = arith.mulf %10, %11 : vector<8x128xf32>
    %13 = vector.extract_strided_slice %6 {offsets = [0, 1], sizes = [8, 1], strides = [1, 1]} : vector<8x2xf32> to vector<8x1xf32>
    %14 = vector.extract_strided_slice %7 {offsets = [1, 0], sizes = [1, 128], strides = [1, 1]} : vector<2x128xf32> to vector<1x128xf32>
    %15 = vector.broadcast %13 : vector<8x1xf32> to vector<8x128xf32>
    %16 = vector.broadcast %14 : vector<1x128xf32> to vector<8x128xf32>
    %17 = arith.mulf %15, %16 : vector<8x128xf32>
    %18 = arith.addf %12, %17 : vector<8x128xf32>
    %c0_10 = arith.constant 0 : index
    %c0_11 = arith.constant 0 : index
    %19 = vector.load %arg10[%c0_10, %c0_11] : memref<8x128xf32, #tpu.memory_space<vmem>>, vector<8x128xf32>
    %c0_12 = arith.constant 0 : index
    %c0_13 = arith.constant 0 : index
    %20 = vector.load %arg4[%c0_12, %c0_13] : memref<8x128xf32, #tpu.memory_space<vmem>>, vector<8x128xf32>
    %21 = arith.addf %19, %20 : vector<8x128xf32>
    %22 = arith.addf %21, %18 : vector<8x128xf32>
    %cst = arith.constant dense<0.000000e+00> : vector<8xf32>
    %23 = vector.multi_reduction <add>, %22, %cst [1] : vector<8x128xf32> to vector<8xf32>
    %24 = vector.shape_cast %23 : vector<8xf32> to vector<8x1xf32>
    %25 = arith.mulf %22, %22 : vector<8x128xf32>
    %cst_14 = arith.constant dense<0.000000e+00> : vector<8xf32>
    %26 = vector.multi_reduction <add>, %25, %cst_14 [1] : vector<8x128xf32> to vector<8xf32>
    %27 = vector.shape_cast %26 : vector<8xf32> to vector<8x1xf32>
    %cst_15 = arith.constant 7.812500e-03 : f32
    %28 = vector.broadcast %cst_15 : f32 to vector<8x1xf32>
    %29 = arith.mulf %24, %28 : vector<8x1xf32>
    %cst_16 = arith.constant 7.812500e-03 : f32
    %30 = vector.broadcast %cst_16 : f32 to vector<8x1xf32>
    %31 = arith.mulf %27, %30 : vector<8x1xf32>
    %32 = arith.mulf %29, %29 : vector<8x1xf32>
    %33 = arith.subf %31, %32 : vector<8x1xf32>
    %34 = vector.broadcast %29 : vector<8x1xf32> to vector<8x128xf32>
    %35 = arith.subf %22, %34 : vector<8x128xf32>
    %cst_17 = arith.constant 9.99999974E-6 : f32
    %36 = vector.broadcast %cst_17 : f32 to vector<8x1xf32>
    %37 = arith.addf %33, %36 : vector<8x1xf32>
    %38 = math.rsqrt %37 : vector<8x1xf32>
    %39 = vector.broadcast %38 : vector<8x1xf32> to vector<8x128xf32>
    %40 = arith.mulf %35, %39 : vector<8x128xf32>
    %c0_18 = arith.constant 0 : index
    %c0_19 = arith.constant 0 : index
    %41 = vector.load %arg7[%c0_18, %c0_19] : memref<1x128xf32, #tpu.memory_space<vmem>>, vector<1x128xf32>
    %42 = vector.broadcast %41 : vector<1x128xf32> to vector<8x128xf32>
    %43 = arith.mulf %40, %42 : vector<8x128xf32>
    %c0_20 = arith.constant 0 : index
    %c0_21 = arith.constant 0 : index
    %44 = vector.load %arg8[%c0_20, %c0_21] : memref<1x128xf32, #tpu.memory_space<vmem>>, vector<1x128xf32>
    %45 = vector.broadcast %44 : vector<1x128xf32> to vector<8x128xf32>
    %46 = arith.addf %43, %45 : vector<8x128xf32>
    %c0_22 = arith.constant 0 : index
    %c0_23 = arith.constant 0 : index
    %c0_24 = arith.constant 0 : index
    %47 = vector.load %arg9[%c0_22, %c0_23, %c0_24] : memref<1x8x128xf32, #tpu.memory_space<vmem>>, vector<1x8x128xf32>
    %48 = vector.shape_cast %47 : vector<1x8x128xf32> to vector<8x128xf32>
    %49 = vector.shape_cast %46 : vector<8x128xf32> to vector<1x8x128xf32>
    tpu.vector_store %arg9[%c0_22, %c0_23, %c0_24], %49 {strides = array<i32>} : memref<1x8x128xf32, #tpu.memory_space<vmem>>, vector<1x8x128xf32>,
    return
  }
  func.func @transform_1(%arg0: i32, %arg1: i32, %arg2: memref<32xi32, #tpu.memory_space<smem>>) -> (i32, i32) {
    %c0_i32 = arith.constant 0 : i32
    %c0_i32_0 = arith.constant 0 : i32
    return %arg1, %c0_i32 : i32, i32
  }
  func.func @transform_2(%arg0: i32, %arg1: i32, %arg2: memref<32xi32, #tpu.memory_space<smem>>) -> (i32, i32, i32) {
    %c0_i32 = arith.constant 0 : i32
    %c0_i32_0 = arith.constant 0 : i32
    return %arg0, %arg1, %c0_i32 : i32, i32, i32
  }
  func.func @transform_3(%arg0: i32, %arg1: i32, %arg2: memref<32xi32, #tpu.memory_space<smem>>) -> (i32, i32) {
    %c0_i32 = arith.constant 0 : i32
    %c0_i32_0 = arith.constant 0 : i32
    %c0_i32_1 = arith.constant 0 : i32
    return %c0_i32, %c0_i32_0 : i32, i32
  }
  func.func @transform_4(%arg0: i32, %arg1: i32, %arg2: memref<32xi32, #tpu.memory_space<smem>>) -> (i32, i32) {
    %c0_i32 = arith.constant 0 : i32
    %c0_i32_0 = arith.constant 0 : i32
    %c0_i32_1 = arith.constant 0 : i32
    return %c0_i32, %c0_i32_0 : i32, i32
  }
  func.func @transform_5(%arg0: i32, %arg1: i32, %arg2: memref<32xi32, #tpu.memory_space<smem>>) -> (i32, i32) {
    %c0_i32 = arith.constant 0 : i32
    %c0_i32_0 = arith.constant 0 : i32
    %c0_i32_1 = arith.constant 0 : i32
    return %c0_i32, %c0_i32_0 : i32, i32
  }
  func.func @transform_6(%arg0: i32, %arg1: i32, %arg2: memref<32xi32, #tpu.memory_space<smem>>) -> (i32, i32, i32) {
    %c0_i32 = arith.constant 0 : i32
    %c0_i32_0 = arith.constant 0 : i32
    return %arg0, %arg1, %c0_i32 : i32, i32, i32
  }
}

</mosaic_0001>

<bundles_post_ra>
// kernel: tpu_custom_call.1
= control target key start
LH: loop header
LB: loop body
LE: loop exit
PB: predicated region body
PF: predicated region fallthrough
CT: control target
= control target key end

     0   :  { %s816_s27 = smov [#allocation5]   ;;  %s1042_s0 = inlined_call_operand.vmem [shape: s32[32], index: 0, kind: input, shape index: {}]   ;;  %s1043_s1 = inlined_call_operand.hbm [shape: f32[64,128], index: 1, kind: input, shape index: {}]   ;;  %s1044_s2 = inlined_call_operand.vmem [shape: f32[16,128], index: 2, kind: input, shape index: {}]   ;;  %s1045_s3 = inlined_call_operand.vmem [shape: f32[2,16,2], index: 3, kind: input, shape index: {}]   ;;  %s1046_s4 = inlined_call_operand.vmem [shape: f32[2,128], index: 4, kind: input, shape index: {}]   ;;  %s1047_s5 = inlined_call_operand.vmem [shape: f32[1,128], index: 5, kind: input, shape index: {}]   ;;  %s1048_s6 = inlined_call_operand.vmem [shape: f32[1,128], index: 6, kind: input, shape index: {}]   ;;  %s1049_s7 = inlined_call_operand.hbm [shape: f32[2,16,128], index: 7, kind: output, shape index: {}]  }
   0x1   :  { %1057 = sst [smem:[#allocation22_spill]] %s1044_s2  ;;  %s13_s26 = sshll.u32 %s1042_s0, 4  ;;  %s14_s26 = int_to_ptr.vmem [resolvable:$true] %s13_s26 }
   0x2   :  { %16 = dma.vmem_to_smem %s14_s26, 16, %s816_s27, [#allocation4] }
   0x3   :  { %768 = dma.done.wait [#allocation4], 16 }
   0x4   :  { %769 = vsyncadd [#allocation4], 4294967280 }
   0x5   :  { %19 = sfence }
   0x6   :  { %20 = vsyncpa [#allocation7], 0 }
   0x7   :  { %22 = vsyncpa [#allocation7 + $0x1], 0  ;;  %s863_s28 = smov 0   ;;  %s865_s29 = smov 0  }
   0x8   :  { %s867_s30 = smov 0   ;;  %s869_s8 = smov 0  }
   0x9   :  { %s871_s9 = smov 0   ;;  %s873_s10 = smov 0  }
   0xa   :  { %s875_s0 = smov 0   ;;  %s877_s11 = smov 0  }
   0xb LB: > { %1058 = sst [smem:[#allocation15_spill]] %s786_s30  ;;  %s544_s12 = sadd.s32 4294967295, %s806_s11   ;;  %s806_s11 = sphi %s877_s11, %s28_s11   ;;  %s802_s0 = sphi %s875_s0, %s1077_s0   ;;  %s798_s10 = sphi %s873_s10, %s1076_s10   ;;  %s794_s9 = sphi %s871_s9, %s1075_s9   ;;  %s790_s8 = sphi %s869_s8, %s1074_s8   ;;  %s786_s30 = sphi %s867_s30, %s1073_s30   ;;  %s782_s29 = sphi %s865_s29, %s1079_s29   ;;  %s778_s28 = sphi %s863_s28, %s1078_s28  }
   0xc   : > { %1059 = sst [smem:[#allocation16_spill]] %s798_s10  ;;  %s545_s13 = sadd.s32 4294967294, %s806_s11  }
   0xd   : > { %1060 = sst [smem:[#allocation17_spill]] %s802_s0  ;;  %s37_s14 = sadd.s32 1, %s798_s10 }
   0xe   : > { %p38_p0 = scmp.ge.s32.totalorder %s37_s14, 2  ;;  %s40_s15 = sadd.s32 1, %s802_s0 }
   0xf   : > { %p176_p1 = scmp.ne.s32.totalorder %s786_s30, %s782_s29  ;;  %p177_p2 = scmp.eq.s32.totalorder %s544_s12, 3 }
  0x10   : > { %s1081_s14 = smov (%p38_p0, %s37_s14), 0  ;;  %s1083_s15 = smov (!%p38_p0, %s40_s15), %s802_s0 }
  0x11   : > { %1061 = sst [smem:[#allocation18_spill]] %s1081_s14  ;;  %s162_s16 = ssub.s32 %s798_s10, %s1081_s14 }
  0x12   : > { %p914_p3 = por %p177_p2, %p176_p1  ;;  %p42_p4 = scmp.ge.s32.totalorder %s1083_s15, 2 }
  0x13   : > { %p182_p5 = scmp.ne.s32.totalorder %s782_s29, %s778_s28  ;;  %p183_p6 = scmp.eq.s32.totalorder %s545_s13, 3 }
  0x14   : > { %p548_p7 = scmp.ge.s32.totalorder %s806_s11, 1  ;;  %s1085_s15 = smov (%p42_p4, %s1083_s15), 0 }
  0x15   : > { %1063 = sst [smem:[#allocation19_spill]] %s1085_s15  ;;  %p923_p8 = por %p183_p6, %p182_p5 }
  0x16   : > { %p228_p9 = scmp.lt.s32.totalorder %s806_s11, 5  ;;  %s161_s19 = ssub.s32 %s802_s0, %s1085_s15 }
  0x17   : > { %s1064_s18 = scalar_select %p923_p8, 1, 0 }
  0x18   : > { %s166_s20 = sadd.s32 1, %s786_s30  ;;  %s163_s21 = sor.u32 %s162_s16, %s161_s19 }
  0x19   : > { %1065 = sst [smem:[#allocation20_spill]] %s1064_s18  ;;  %p229_p10 = pnand %p548_p7, %p228_p9 }
  0x1a   : > { %p164_p11 = scmp.eq.s32.totalorder %s163_s21, 0  ;;  %s1054_s23 = sand.u32 (!%p229_p10), 1, %s782_s29  }
  0x1b   : > { %232 = sbr.rel (%p229_p10) target bundleno = 369 (0x171), region = 40  ;;  %p263_p12 = scmp.lt.s32.totalorder (!%p229_p10), %s790_s8, 1 }
  0x1c   : > { %s932_s22 = scalar_select %p164_p11, %s786_s30, %s166_s20  }
  0x1d   : > { %s938_s24 = sshll.u32 (!%p229_p10), %s1054_s23, 3  ;;  %p267_p13 = scmp.lt.s32.totalorder (!%p229_p10), %s794_s9, 1 }
  0x1e   : > { %1066 = sst [smem:[#allocation21_spill]] %s932_s22  ;;  %s553_s25 = sshll.u32 (!%p229_p10), %s794_s9, 4 }
  0x1f   : > { %s554_s13 = sshll.u32 (!%p229_p10), %s790_s8, 3  ;;  %s1067_s2 = sld [smem:[#allocation22_spill]] (!%p229_p10) }
  0x20   : > { %s264_s26 = scalar_select %p263_p12, %s790_s8, 1 }
  0x21   : > { %s268_s27 = scalar_select %p267_p13, %s794_s9, 1 }
  0x22   : > { %s550_s12 = sshll.u32 %s264_s26, 3  ;;  %s950_s14 = sadd.s32 %s554_s13, %s553_s25 }
  0x23   : > { %s551_s21 = sshll.u32 %s268_s27, 1  ;;  %s958_s18 = smov 0  }
  0x24   : > { %s272_s15 = sadd.s32 %s551_s21, %s264_s26 }
  0x25   : > { %s948_s20 = scalar_lea.vmem %s1067_s2, %s550_s12  ;;  %s552_s0 = sshll.u32 %s272_s15, 3 }
  0x26   : > { %s955_s22 = scalar_lea.vmem %s1045_s3, %s552_s0 }
  0x27 LB: >> { %s284_s25 = sadd.s32 %s810_s18, %s950_s14  ;;  %s287_s15 = scalar_lea.vmem [#allocation2], %s810_s18  ;;  %s810_s18 = sphi %s958_s18, %s283_s18  }
  0x28   : >> { %s285_s26 = sld [smem:[#allocation5 + %s284_s25]]  ;;  %s966_s27 = sshll.u32 %s287_s15, 4  ;;  %s299_s27 = int_to_ptr.vmem [resolvable:$true] %s966_s27 }
  0x29   : >> { %s288_s13 = scalar_lea.sflag [#allocation3], %s810_s18  ;;  %s680_s25 = scalar_lea.hbm %s1043_s1, 64 }
  0x2e   : >> { %s286_s23 = scalar_lea.hbm %s1043_s1, %s285_s26 }
  0x2f   : >> { %s296_s12 = sshll.u32 %s286_s23, 4  ;;  %s297_s12 = int_to_ptr.hbm [resolvable:$true] %s296_s12 }
  0x30   : >> { %s676_s16 = sshra.s32 %s297_s12, 4  ;;  %s677_s16 = int_to_ptr.hbm [resolvable:$true] %s676_s16 }
  0x31   : >> { %s678_s19 = scalar_lea.hbm %s677_s16, 1  ;;  %p681_p1 = scmp.lt.s32.totalorder %s677_s16, %s1043_s1 }
  0x32   : >> { %p679_p0 = scmp.ne.s32.totalorder %s677_s16, %s678_s19  ;;  %p682_p2 = scmp.lt.s32.totalorder %s680_s25, %s678_s19 }
  0x34   : >> { %p683_p4 = por %p682_p2, %p681_p1 }
  0x36   : >> { %p684_p5 = pnand %p683_p4, %p679_p0 }
  0x38   : >> { %687 = shalt.err (!%p684_p5)  }
  0x39   : >> { %s688_s26 = sshra.s32 %s299_s27, 4  ;;  %s817_s0 = smov [#allocation2]   ;;  %s689_s26 = int_to_ptr.vmem [resolvable:$true] %s688_s26 }
  0x3a   : >> { %s690_s10 = scalar_lea.vmem %s689_s26, 1  ;;  %s692_s23 = scalar_lea.vmem %s817_s0, 8 }
  0x3b   : >> { %p691_p6 = scmp.ne.s32.totalorder %s689_s26, %s690_s10  ;;  %p693_p7 = scmp.lt.s32.totalorder %s689_s26, [#allocation2] }
  0x3c   : >> { %p694_p9 = scmp.lt.s32.totalorder %s692_s23, %s690_s10 }
  0x3e   : >> { %p695_p10 = por %p694_p9, %p693_p7 }
  0x40   : >> { %p696_p11 = pnand %p695_p10, %p691_p6 }
  0x42   : >> { %699 = shalt.err (!%p696_p11)  }
  0x43   : >> { %301 = dma.hbm_to_vmem [thread:$0]  %s297_s12, 16, %s299_s27, %s288_s13 }
  0x44   : >> { %s283_s18 = sadd.s32 1, %s810_s18  }
  0x45   : >> { %p280_p12 = scmp.ge.s32.totalorder %s283_s18, 8  }
  0x46   : > { %s812_s2 = smov (%p280_p12), 0  }
  0x47   : > { %282 = sbr.rel (!%p280_p12) target bundleno = 39 (0x27), region = 107 }
  0x4c LB: >> { %s310_s30 = scalar_lea.sflag [#allocation3], %s814_s2  ;;  %s814_s2 = sphi %s812_s2, %s307_s2  }
  0x4d   : >> { %770 = dma.done.wait %s310_s30, 16 }
  0x4e   : >> { %771 = vsyncadd %s310_s30, 4294967280  ;;  %s307_s2 = sadd.s32 1, %s814_s2  }
  0x4f   : >> { %p304_p13 = scmp.ge.s32.totalorder %s307_s2, 8  }
  0x50   : > { %v314_v0 = vld [vmem:[%s955_s22] sm:$0xff] (%p304_p13)  ;;  %v818_v1 = vmov (%p304_p13), 0   ;;  %v819_v2 = vmov (%p304_p13), 1   ;;  %s556_s22 = sshll.u32 (%p304_p13), %s794_s9, 1  ;;  %s1068_s25 = scalar_lea.vmem (%p304_p13), [#allocation6], %s938_s24 }
  0x51   : > { %306 = sbr.rel (!%p304_p13) target bundleno = 76 (0x4c), region = 118  ;;  %658 = vset.pattern.permute.xlu0 (%p304_p13), %v818_v1  ;;  %v315_v4 = vld [vmem:[%s1046_s4] sm:$0x3] (%p304_p13)  ;;  %s382_s15 = sshll.u32 (%p304_p13), %s1068_s25, 4  ;;  %s383_s15 = int_to_ptr.vmem [resolvable:$true] %s382_s15 }
  0x52   : > { %318 = vperm.xlu0 (%p304_p13), %658, %v314_v0   ;;  %v321_v5 = vperm.slane (%p304_p13), %v315_v4, 0  ;;  %v327_v6 = vperm.slane (%p304_p13), %v315_v4, 1  ;;  %v330_v7 = vld [vmem:[#allocation2] sm:$0xff] (%p304_p13)  ;;  %s1069_s10 = smov (%p304_p13), %s1068_s25  ;;  %s1070_s0 = sand.u32 (%p304_p13), 1, %s782_s29  }
  0x53   : > { %v331_v8 = vld [vmem:[%s948_s20] sm:$0xff] (%p304_p13)  ;;  %s378_s20 = sadd.s32 (%p304_p13), %s790_s8, %s556_s22  ;;  %s368_s23 = scalar_lea.sflag (%p304_p13), [#allocation7], %s1070_s0 }
  0x54   : > { %v332_v12 = vadd.f32 (%p304_p13), %v331_v8, %v330_v7  ;;  %s557_s27 = sshll.u32 (%p304_p13), %s378_s20, 3  ;;  %v660_v30 = vld [vmem:[%s1047_s5] ss:$0 sm:$0xff] (%p304_p13)  ;;  %s720_s22 = scalar_lea.hbm (%p304_p13), %s1049_s7, 32 }
  0x55   : > { %s380_s9 = scalar_lea.hbm (%p304_p13), %s1049_s7, %s557_s27  ;;  %v661_v33 = vld [vmem:[%s1048_s6] ss:$0 sm:$0xff] (%p304_p13) }
  0x56   : > { %s384_s26 = sshll.u32 %s380_s9, 4  ;;  %s385_s26 = int_to_ptr.hbm [resolvable:$true] %s384_s26 }
  0x57   : > { %s714_s2 = sshra.s32 %s385_s26, 4  ;;  %s715_s2 = int_to_ptr.hbm [resolvable:$true] %s714_s2 }
  0x58   : > { %s716_s30 = scalar_lea.hbm %s715_s2, 8  ;;  %p721_p4 = scmp.lt.s32.totalorder %s715_s2, %s1049_s7 }
  0x59   : > { %p717_p0 = scmp.ne.s32.totalorder %s715_s2, %s716_s30  ;;  %p722_p5 = scmp.lt.s32.totalorder %s720_s22, %s716_s30 }
  0x5a   : > { %659 = vset.pattern.permute.xlu0 %v819_v2 }
  0x5b   : > { %324 = vperm.xlu0 %659, %v314_v0   ;;  %p718_p1 = pnand %p717_p0, %p914_p3  ;;  %p723_p6 = por %p722_p5, %p721_p4 }
  0x5d   : > { %p719_p2 = pneg %p718_p1 }
  0x5f   : > { %p724_p7 = pnand %p723_p6, %p719_p2 }
  0xc4   : > { %v319_v3 = vpop.permute.xlu0 %318 }
  0xc5   : > { %v322_v10 = vmul.f32 %v321_v5, %v319_v3 }
  0xcd   : > { %v325_v9 = vpop.permute.xlu0 %324 }
  0xce   : > { %v328_v11 = vmul.f32 %v327_v6, %v325_v9 }
  0xd0   : > { %v329_v13 = vadd.f32 %v328_v11, %v322_v10 }
  0xd2   : > { %v333_v14 = vadd.f32 %v332_v12, %v329_v13 }
  0xd4   : > { %334 = vadd.xlane.f32.xlu1 %v333_v14  ;;  %v336_v15 = vmul.f32 %v333_v14, %v333_v14 }
  0xdc   : > { %337 = vadd.xlane.f32.xlu1 %v336_v15 }
 0x147   : > { %v335_v16 = vpop.xlane.xlu1 %334 }
 0x148   : > { %v339_v17 = vmul.f32 0.0078125, %v335_v16 }
 0x14a   : > { %v341_v19 = vmul.f32 %v339_v17, %v339_v17  ;;  %v343_v29 = vsub.f32 %v333_v14, %v339_v17 }
 0x14f   : > { %v338_v18 = vpop.xlane.xlu1 %337 }
 0x150   : > { %v340_v20 = vmul.f32 0.0078125, %v338_v18 }
 0x152   : > { %v342_v21 = vsub.f32 %v340_v20, %v341_v19 }
 0x154   : > { %v344_v22 = vadd.f32 1e-05, %v342_v21 }
 0x156   : > { %662 = vrsqrt.f32 %v344_v22  ;;  %vm351_vm1 = vweird.f32 %v344_v22 }
 0x15c   : > { %v663_v23 = vpop.eup %662 }
 0x15d   : > { %v346_v24 = vmul.f32 %v663_v23, %v344_v22  ;;  %vm352_vm0 = vweird.f32 %v663_v23 }
 0x15e   : > { %vm353_vm2 = vmor %vm351_vm1, %vm352_vm0 }
 0x15f   : > { %v347_v25 = vmul.f32 %v663_v23, %v346_v24 }
 0x161   : > { %v348_v26 = vmul.f32 0.5, %v347_v25 }
 0x163   : > { %v349_v27 = vsub.f32 1.5, %v348_v26 }
 0x165   : > { %v350_v28 = vmul.f32 %v663_v23, %v349_v27 }
 0x167   : > { %v354_v31 = vsel %vm353_vm2, %v663_v23, %v350_v28 }
 0x168   : > { %v355_v32 = vmul.f32 %v354_v31, %v343_v29 }
 0x16a   : > { %v360_v34 = vmul.f32 %v660_v30, %v355_v32 }
 0x16c   : > { %v365_v35 = vadd.f32 %v661_v33, %v360_v34 }
 0x16e   : > { %366 = vst [vmem:[%s1069_s10] sm:$0xff] %v365_v35 }
 0x16f   : > { %727 = shalt.err (!%p724_p7)
}
 0x170   : > { %568 = dma.vmem_to_hbm [thread:$0]  (%p914_p3), %s383_s15, 128, %s385_s26, %s368_s23  }
 0x171 PF: > { %p574_p9 = scmp.ge.s32.totalorder %s806_s11, 2  ;;  %s396_s12 = sand.u32 1, %s778_s28  }
 0x172   : > { %s397_s13 = scalar_lea.sflag [#allocation7], %s396_s12 }
 0x173   : > { %p571_p10 = pnand %p574_p9, %p923_p8 }
 0x175   : > { %p572_p11 = pneg %p571_p10 }
 0x177   : > { %773 = dma.done.wait (%p572_p11), %s397_s13, 128  }
 0x178   : > { %775 = vsyncadd (%p572_p11), %s397_s13, 4294967168  ;;  %s28_s11 = sadd.s32 1, %s806_s11   ;;  %s1072_s16 = sld [smem:[#allocation15_spill]] }
 0x179   : > { %p25_p12 = scmp.ge.s32.totalorder %s28_s11, 6   ;;  %s1073_s30 = sld [smem:[#allocation21_spill]] }
 0x17a   : > { %s1074_s8 = sld [smem:[#allocation16_spill]]  ;;  %s1078_s28 = smov %s782_s29 }
 0x17b   : > { %s1075_s9 = sld [smem:[#allocation17_spill]]  ;;  %27 = sbr.rel (!%p25_p12) target bundleno = 11 (0xb), region = 129 }
 0x17c   : > { %s1076_s10 = sld [smem:[#allocation18_spill]] }
 0x17d   : > { %s1077_s0 = sld [smem:[#allocation19_spill]] }
 0x17e   : > { %s1079_s29 = smov %s1072_s16 }
 0x180   :  { %403 = vsyncpa [#allocation7], 1 }
 0x181   :  { %405 = vsyncpa [#allocation7 + $0x1], 1 }
 0x182   :  { %406 = vsyncmov [#allocation3] }
 0x185   :  { %s407_s17 = vpop.sfrf %406 }
 0x186   :  { %p560_p3 = scmp.ne.s32.totalorder %s407_s17, 0 }
 0x188   :  { %411 = shalt.err (%p560_p3)  }
 0x189   :  { %413 = vsyncmov [#allocation3 + $0x1] }
 0x18c   :  { %s414_s19 = vpop.sfrf %413 }
 0x18d   :  { %p561_p8 = scmp.ne.s32.totalorder %s414_s19, 0 }
 0x18f   :  { %418 = shalt.err (%p561_p8)  }
 0x190   :  { %420 = vsyncmov [#allocation3 + $0x2] }
 0x193   :  { %s421_s21 = vpop.sfrf %420 }
 0x194   :  { %p562_p13 = scmp.ne.s32.totalorder %s421_s21, 0 }
 0x196   :  { %425 = shalt.err (%p562_p13)  }
 0x197   :  { %427 = vsyncmov [#allocation3 + $0x3] }
 0x19a   :  { %s428_s25 = vpop.sfrf %427 }
 0x19b   :  { %p563_p0 = scmp.ne.s32.totalorder %s428_s25, 0 }
 0x19d   :  { %432 = shalt.err (%p563_p0)  }
 0x19e   :  { %434 = vsyncmov [#allocation3 + $0x4] }
 0x1a1   :  { %s435_s11 = vpop.sfrf %434 }
 0x1a2   :  { %p564_p1 = scmp.ne.s32.totalorder %s435_s11, 0 }
 0x1a4   :  { %439 = shalt.err (%p564_p1)  }
 0x1a5   :  { %441 = vsyncmov [#allocation3 + $0x5] }
 0x1a8   :  { %s442_s1 = vpop.sfrf %441 }
 0x1a9   :  { %p565_p2 = scmp.ne.s32.totalorder %s442_s1, 0 }
 0x1ab   :  { %446 = shalt.err (%p565_p2)  }
 0x1ac   :  { %448 = vsyncmov [#allocation3 + $0x6] }
 0x1af   :  { %s449_s3 = vpop.sfrf %448 }
 0x1b0   :  { %p566_p4 = scmp.ne.s32.totalorder %s449_s3, 0 }
 0x1b2   :  { %453 = shalt.err (%p566_p4)  }
 0x1b3   :  { %455 = vsyncmov [#allocation3 + $0x7] }
 0x1b6   :  { %s456_s4 = vpop.sfrf %455 }
 0x1b7   :  { %p567_p5 = scmp.ne.s32.totalorder %s456_s4, 0 }
 0x1b9   :  { %460 = shalt.err (%p567_p5)  }

</bundles_post_ra>
